<compile_context>
chip_gen: v6e
topology: v6e:2x2x1
jax: 0.10.0
libtpu: 0.0.40
codegen_flags: <defaults>
</compile_context>

<pallas_src>
import functools
import math

import jax
import jax.numpy as jnp
from jax.experimental import pallas as pl
from jax.experimental.pallas import tpu as pltpu


# --------------------------------------------------------------------------
# Per-generation configuration (computed once, conservative fallbacks).
# --------------------------------------------------------------------------
def _tpu_vmem_capacity_bytes():
    try:
        info = pltpu.get_tpu_info()
        cap = getattr(info, "vmem_capacity_bytes", None)
        if cap:
            return int(cap)
    except Exception:
        pass
    return 64 * 1024 * 1024   # conservative (v7x-sized) fallback


def _eup_supports_bf16():
    # v6e / v7x have a bf16 EUP path; v5e and older do not.
    try:
        kind = jax.devices()[0].device_kind.lower()
    except Exception:
        return False
    return any(tag in kind for tag in ("v6", "6e", "v7", "7x"))


_VMEM_CAP = _tpu_vmem_capacity_bytes()
_BIG_VMEM = _VMEM_CAP >= 96 * 1024 * 1024          # v5e / v6e (128 MiB parts)
_VMEM_LIMIT = (96 if _BIG_VMEM else 44) * 1024 * 1024
_BF16_EXP = _eup_supports_bf16()


def _choose_tile(dim, target, granule, prefer_divisor=False):
    """Tile size <= target (never the full, possibly huge, dimension).

    If dim <= target the full dim is used (always a legal block shape).
    With prefer_divisor=True, the largest granule-multiple divisor of dim
    that is <= target is preferred (no ragged edge / no padding needed)."""
    if dim <= target:
        return dim
    t = max((target // granule) * granule, granule)
    if prefer_divisor:
        for cand in range(t, granule - 1, -granule):
            if dim % cand == 0:
                return cand
    return t


# --------------------------------------------------------------------------
# Kernel 1: tiled dense projection  y = x @ W + b
# --------------------------------------------------------------------------
def _linear_kernel(x_ref, w_ref, b_ref, o_ref, acc_ref):
    k = pl.program_id(2)

    @pl.when(k == 0)
    def _():
        acc_ref[...] = jnp.zeros_like(acc_ref)

    # bf16 x bf16 -> f32 accumulation on the MXU
    acc_ref[...] += jnp.dot(x_ref[...], w_ref[...],
                            preferred_element_type=jnp.float32)

    @pl.when(k == pl.num_programs(2) - 1)
    def _():
        o_ref[...] = (acc_ref[...] + b_ref[...]).astype(o_ref.dtype)


def linear(x2d, w, b, *, out_dtype=jnp.float32):
    """x2d: (M, K), w: (K, Nout), b: (Nout,) -> (M, Nout) in out_dtype."""
    M, K = x2d.shape
    Nout = w.shape[1]

    xb = x2d.astype(jnp.bfloat16)
    wb = w.astype(jnp.bfloat16)
    b2d = b.reshape(1, Nout).astype(jnp.float32)

    tm = _choose_tile(M, 1024 if _BIG_VMEM else 512, 8)
    tn = _choose_tile(Nout, 512 if _BIG_VMEM else 256, 128)
    tk = _choose_tile(K, 512, 128, prefer_divisor=True)

    # The contraction axis must be exact: zero-pad K when the tile is ragged
    # (zeros contribute nothing to the accumulation).  M / N ragged edges are
    # handled by Pallas edge masking (rows / cols are independent).
    if K % tk != 0:
        pad = tk - (K % tk)
        xb = jnp.pad(xb, ((0, 0), (0, pad)))
        wb = jnp.pad(wb, ((0, pad), (0, 0)))
        K = K + pad

    grid = (pl.cdiv(M, tm), pl.cdiv(Nout, tn), K // tk)

    return pl.pallas_call(
        _linear_kernel,
        out_shape=jax.ShapeDtypeStruct((M, Nout), out_dtype),
        grid_spec=pltpu.PrefetchScalarGridSpec(
            num_scalar_prefetch=0,
            grid=grid,
            in_specs=[
                pl.BlockSpec((tm, tk), lambda i, j, k: (i, k)),
                pl.BlockSpec((tk, tn), lambda i, j, k: (k, j)),
                pl.BlockSpec((1, tn), lambda i, j, k: (0, j)),
            ],
            out_specs=pl.BlockSpec((tm, tn), lambda i, j, k: (i, j)),
            scratch_shapes=[pltpu.VMEM((tm, tn), jnp.float32)],
        ),
        compiler_params=pltpu.CompilerParams(
            dimension_semantics=("parallel", "parallel", "arbitrary"),
            vmem_limit_bytes=_VMEM_LIMIT,
        ),
    )(xb, wb, b2d)


# --------------------------------------------------------------------------
# Kernel 2: flash-style attention, all heads of one batch per grid step.
#   q: (N, L, H*dk), k: (N, S, H*dk), v: (N, S, H*dv) -> (N, L, H*dv)
# Blocks are lane-dense over the packed head*feature axis; heads are static
# lane slices inside the kernel.  1/sqrt(dk) already folded into Q.
# --------------------------------------------------------------------------
def _attention_kernel(q_ref, k_ref, v_ref, o_ref, m_sc, l_sc, acc_sc,
                      *, n_heads, d_k, d_v, s_valid, ts, need_mask, bf16_exp):
    ki = pl.program_id(2)

    @pl.when(ki == 0)
    def _():
        m_sc[...] = jnp.full_like(m_sc, -jnp.inf)
        l_sc[...] = jnp.zeros_like(l_sc)
        acc_sc[...] = jnp.zeros_like(acc_sc)

    q_all = q_ref[0]          # (tq, H*dk) bf16, lane-dense load
    k_all = k_ref[0]          # (ts, H*dk) bf16
    v_all = v_ref[0]          # (ts, H*dv) bf16
    tq = q_all.shape[0]

    if need_mask:
        col = ki * ts + jax.lax.broadcasted_iota(jnp.int32, (tq, ts), 1)
        col_ok = col < s_valid

    for h in range(n_heads):                         # static unroll over heads
        q = q_all[:, h * d_k:(h + 1) * d_k]          # (tq, dk)
        k = k_all[:, h * d_k:(h + 1) * d_k]          # (ts, dk)
        v = v_all[:, h * d_v:(h + 1) * d_v]          # (ts, dv)

        # contract over dk of both operands: no explicit k.T / XLU transpose
        s = jax.lax.dot_general(
            q, k, dimension_numbers=(((1,), (1,)), ((), ())),
            preferred_element_type=jnp.float32)      # (tq, ts) f32

        if need_mask:
            s = jnp.where(col_ok, s, -1e30)          # exclude zero-padded keys

        m_prev = m_sc[h]                             # (tq, 1) f32
        m_new = jnp.maximum(m_prev, jnp.max(s, axis=-1, keepdims=True))
        alpha = jnp.exp(m_prev - m_new)

        if bf16_exp:
            # v6e / v7x: exp on the EUP bf16 path; stats stay in f32.
            p = jnp.exp((s - m_new).astype(jnp.bfloat16))      # (tq, ts) bf16
            p_sum = jnp.sum(p.astype(jnp.float32), axis=-1, keepdims=True)
        else:
            p_f32 = jnp.exp(s - m_new)
            p_sum = jnp.sum(p_f32, axis=-1, keepdims=True)
            p = p_f32.astype(jnp.bfloat16)

        l_sc[h] = alpha * l_sc[h] + p_sum
        acc_sc[h] = alpha * acc_sc[h] + jax.lax.dot_general(
            p, v, dimension_numbers=(((1,), (0,)), ((), ())),
            preferred_element_type=jnp.float32)               # (tq, dv) f32
        m_sc[h] = m_new

    @pl.when(ki == pl.num_programs(2) - 1)
    def _():
        # One lane-dense (tq, H*dv) output slab -> single unmasked store.
        pieces = []
        for h in range(n_heads):
            inv_l = pl.reciprocal(l_sc[h], approx=True)        # EUP slot
            pieces.append(acc_sc[h] * inv_l)
        o_ref[0] = jnp.concatenate(pieces, axis=-1).astype(o_ref.dtype)


def flash_attention(q3, k3, v3, *, n_heads, d_k, d_v):
    N, L, _ = q3.shape
    _, S, _ = k3.shape

    tq = _choose_tile(L, 512 if _BIG_VMEM else 256, 8)
    ts = _choose_tile(S, 512 if _BIG_VMEM else 256, 8, prefer_divisor=True)

    # Keep >= 2 parallel work units so both v7x TensorCores get work.
    while N * pl.cdiv(L, tq) < 2 and tq >= 16 and (tq // 2) % 8 == 0:
        tq //= 2

    # Zero-pad a ragged key axis; padded keys are masked out of the softmax
    # inside the kernel (padded V rows are exact zeros -> safe in the PV dot).
    s_pad = pl.cdiv(S, ts) * ts
    need_mask = s_pad != S
    if need_mask:
        k3 = jnp.pad(k3, ((0, 0), (0, s_pad - S), (0, 0)))
        v3 = jnp.pad(v3, ((0, 0), (0, s_pad - S), (0, 0)))

    grid = (N, pl.cdiv(L, tq), s_pad // ts)

    kernel = functools.partial(
        _attention_kernel, n_heads=n_heads, d_k=d_k, d_v=d_v,
        s_valid=S, ts=ts, need_mask=need_mask, bf16_exp=_BF16_EXP)

    hdk = n_heads * d_k
    hdv = n_heads * d_v
    return pl.pallas_call(
        kernel,
        out_shape=jax.ShapeDtypeStruct((N, L, hdv), jnp.bfloat16),
        grid_spec=pltpu.PrefetchScalarGridSpec(
            num_scalar_prefetch=0,
            grid=grid,
            in_specs=[
                pl.BlockSpec((1, tq, hdk), lambda b, qi, ki: (b, qi, 0)),
                pl.BlockSpec((1, ts, hdk), lambda b, qi, ki: (b, ki, 0)),
                pl.BlockSpec((1, ts, hdv), lambda b, qi, ki: (b, ki, 0)),
            ],
            out_specs=pl.BlockSpec((1, tq, hdv), lambda b, qi, ki: (b, qi, 0)),
            scratch_shapes=[
                pltpu.VMEM((n_heads, tq, 1), jnp.float32),    # running max m
                pltpu.VMEM((n_heads, tq, 1), jnp.float32),    # running denom l
                pltpu.VMEM((n_heads, tq, d_v), jnp.float32),  # running numerator
            ],
        ),
        compiler_params=pltpu.CompilerParams(
            dimension_semantics=("parallel", "parallel", "arbitrary"),
            vmem_limit_bytes=_VMEM_LIMIT,
        ),
    )(q3, k3, v3)


# --------------------------------------------------------------------------
# AttentionLayer: parameter init + forward
# --------------------------------------------------------------------------
def init_attention_layer_params(key, d_model, n_heads, d_keys=None, d_values=None):
    d_keys = d_keys or d_model // n_heads
    d_values = d_values or d_model // n_heads
    ks = jax.random.split(key, 8)

    def lin_init(wk, bk, fan_in, fan_out):
        # PyTorch nn.Linear default: U(-1/sqrt(fan_in), 1/sqrt(fan_in))
        bound = 1.0 / math.sqrt(fan_in)
        w = jax.random.uniform(wk, (fan_in, fan_out), jnp.float32, -bound, bound)
        b = jax.random.uniform(bk, (fan_out,), jnp.float32, -bound, bound)
        return w, b

    q_w, q_b = lin_init(ks[0], ks[1], d_model, d_keys * n_heads)
    scale = 1.0 / math.sqrt(d_keys)
    return {
        "q_proj": (q_w, q_b),
        # 1/sqrt(dk) folded into the query projection (one-time transform):
        "q_proj_scaled": (q_w * scale, q_b * scale),
        "k_proj": lin_init(ks[2], ks[3], d_model, d_keys * n_heads),
        "v_proj": lin_init(ks[4], ks[5], d_model, d_values * n_heads),
        "o_proj": lin_init(ks[6], ks[7], d_values * n_heads, d_model),
        "n_heads": n_heads,
        "d_keys": d_keys,
        "d_values": d_values,
    }


def attention_layer_forward(params, queries, keys, values):
    N, L, d_model = queries.shape
    _, S, _ = keys.shape
    H = params["n_heads"]
    dk = params["d_keys"]
    dv = params["d_values"]

    # Projections (tiled Pallas matmuls, bf16 in / f32 accumulate / bf16 out).
    q = linear(queries.reshape(N * L, d_model), *params["q_proj_scaled"],
               out_dtype=jnp.bfloat16)                           # (N*L, H*dk)
    k = linear(keys.reshape(N * S, d_model), *params["k_proj"],
               out_dtype=jnp.bfloat16)                           # (N*S, H*dk)
    v = linear(values.reshape(N * S, d_model), *params["v_proj"],
               out_dtype=jnp.bfloat16)                           # (N*S, H*dv)

    # Lane-dense packed-head layout; head split/merge is a free reshape.
    q3 = q.reshape(N, L, H * dk)
    k3 = k.reshape(N, S, H * dk)
    v3 = v.reshape(N, S, H * dv)

    ctx = flash_attention(q3, k3, v3, n_heads=H, d_k=dk, d_v=dv)  # (N, L, H*dv)

    out = linear(ctx.reshape(N * L, H * dv), *params["o_proj"],
                 out_dtype=jnp.float32)                           # (N*L, d_model)
    return out.reshape(N, L, d_model)


# --------------------------------------------------------------------------
# reference (pure JAX, f32) for a sanity check
# --------------------------------------------------------------------------
def reference_forward(params, queries, keys, values):
    N, L, d_model = queries.shape
    _, S, _ = keys.shape
    H = params["n_heads"]
    dk = params["d_keys"]
    dv = params["d_values"]
    q = (queries @ params["q_proj"][0] + params["q_proj"][1]).reshape(N, L, H, dk)
    k = (keys @ params["k_proj"][0] + params["k_proj"][1]).reshape(N, S, H, dk)
    v = (values @ params["v_proj"][0] + params["v_proj"][1]).reshape(N, S, H, dv)
    scores = jnp.einsum("blhe,bshe->bhls", q, k) / math.sqrt(dk)
    p = jax.nn.softmax(scores, axis=-1)
    ctx = jnp.einsum("bhls,bshd->blhd", p, v).reshape(N, L, H * dv)
    return ctx @ params["o_proj"][0] + params["o_proj"][1]


if __name__ == "__main__":
    key = jax.random.PRNGKey(0)
    k_param, k_q, k_k, k_v = jax.random.split(key, 4)

    d_model, n_heads = 32, 4
    N, L, S = 2, 8, 8

    params = init_attention_layer_params(k_param, d_model, n_heads)

    queries = jax.random.normal(k_q, (N, L, d_model), jnp.float32)
    keys = jax.random.normal(k_k, (N, S, d_model), jnp.float32)
    values = jax.random.normal(k_v, (N, S, d_model), jnp.float32)

    out = attention_layer_forward(params, queries, keys, values)
    out = jax.block_until_ready(out)

    ref = reference_forward(params, queries, keys, values)
    assert out.shape == (N, L, d_model)
    # bf16 MXU inputs (and bf16 exp on v6e/v7x) -> looser tolerance than f32
    assert jnp.allclose(out, ref, atol=5e-2, rtol=5e-2), "mismatch vs reference"

    print("KERNEL_OK")
</pallas_src>

<mosaic_0001>
module attributes {stable_mosaic.version = 11 : i64} {
  func.func @_linear_kernel(%arg0: i32, %arg1: i32, %arg2: i32, %arg3: memref<16x32xbf16, #tpu.memory_space<vmem>>, %arg4: memref<32x32xbf16, #tpu.memory_space<vmem>>, %arg5: memref<1x32xf32, #tpu.memory_space<vmem>>, %arg6: memref<16x32xbf16, #tpu.memory_space<vmem>>, %arg7: memref<16x32xf32, #tpu.memory_space<vmem>>) attributes {dimension_semantics = [#tpu.dimension_semantics<parallel>, #tpu.dimension_semantics<parallel>, #tpu.dimension_semantics<arbitrary>], iteration_bounds = array<i64: 1, 1, 1>, scalar_prefetch = 0 : i64, scratch_operands = 1 : i64, tpu.core_type = #tpu.core_type<tc>, window_params = [{transform_indices = @transform_0, window_bounds = array<i64: 16, 32>}, {transform_indices = @transform_1, window_bounds = array<i64: 32, 32>}, {transform_indices = @transform_2, window_bounds = array<i64: 1, 32>}, {transform_indices = @transform_3, window_bounds = array<i64: 16, 32>}]} {
    %c0_i32 = arith.constant 0 : i32
    %0 = arith.cmpi eq, %arg2, %c0_i32 : i32
    %1 = arith.extui %0 : i1 to i32
    %c0_i32_0 = arith.constant 0 : i32
    %2 = arith.cmpi ne, %1, %c0_i32_0 : i32
    scf.if %2 {
      %cst_10 = arith.constant 0.000000e+00 : f32
      %12 = vector.broadcast %cst_10 : f32 to vector<16x32xf32>
      %c0_11 = arith.constant 0 : index
      %c0_12 = arith.constant 0 : index
      %13 = vector.load %arg7[%c0_11, %c0_12] : memref<16x32xf32, #tpu.memory_space<vmem>>, vector<16x32xf32>
      tpu.vector_store %arg7[%c0_11, %c0_12], %12 {strides = array<i32>} : memref<16x32xf32, #tpu.memory_space<vmem>>, vector<16x32xf32>,
    } else {
    }
    %c0 = arith.constant 0 : index
    %c0_1 = arith.constant 0 : index
    %3 = vector.load %arg7[%c0, %c0_1] : memref<16x32xf32, #tpu.memory_space<vmem>>, vector<16x32xf32>
    %c0_2 = arith.constant 0 : index
    %c0_3 = arith.constant 0 : index
    %4 = vector.load %arg3[%c0_2, %c0_3] : memref<16x32xbf16, #tpu.memory_space<vmem>>, vector<16x32xbf16>
    %c0_4 = arith.constant 0 : index
    %c0_5 = arith.constant 0 : index
    %5 = vector.load %arg4[%c0_4, %c0_5] : memref<32x32xbf16, #tpu.memory_space<vmem>>, vector<32x32xbf16>
    %cst = arith.constant dense<0.000000e+00> : vector<16x32xf32>
    %6 = tpu.matmul %4, %5, %cst {dimension_numbers = #tpu.dot_dimension_numbers<[1], [0], [0], [1], [0, 0, 1, 1], [], []>} : vector<16x32xbf16>, vector<32x32xbf16>, vector<16x32xf32> -> vector<16x32xf32>
    %7 = arith.addf %3, %6 : vector<16x32xf32>
    %c0_6 = arith.constant 0 : index
    %c0_7 = arith.constant 0 : index
    %8 = vector.load %arg7[%c0_6, %c0_7] : memref<16x32xf32, #tpu.memory_space<vmem>>, vector<16x32xf32>
    tpu.vector_store %arg7[%c0_6, %c0_7], %7 {strides = array<i32>} : memref<16x32xf32, #tpu.memory_space<vmem>>, vector<16x32xf32>,
    %c0_i32_8 = arith.constant 0 : i32
    %9 = arith.cmpi eq, %arg2, %c0_i32_8 : i32
    %10 = arith.extui %9 : i1 to i32
    %c0_i32_9 = arith.constant 0 : i32
    %11 = arith.cmpi ne, %10, %c0_i32_9 : i32
    scf.if %11 {
      %c0_10 = arith.constant 0 : index
      %c0_11 = arith.constant 0 : index
      %12 = vector.load %arg7[%c0_10, %c0_11] : memref<16x32xf32, #tpu.memory_space<vmem>>, vector<16x32xf32>
      %c0_12 = arith.constant 0 : index
      %c0_13 = arith.constant 0 : index
      %13 = vector.load %arg5[%c0_12, %c0_13] : memref<1x32xf32, #tpu.memory_space<vmem>>, vector<1x32xf32>
      %14 = vector.broadcast %13 : vector<1x32xf32> to vector<16x32xf32>
      %15 = arith.addf %12, %14 : vector<16x32xf32>
      %16 = arith.truncf %15 : vector<16x32xf32> to vector<16x32xbf16>
      %c0_14 = arith.constant 0 : index
      %c0_15 = arith.constant 0 : index
      %17 = vector.load %arg6[%c0_14, %c0_15] : memref<16x32xbf16, #tpu.memory_space<vmem>>, vector<16x32xbf16>
      tpu.vector_store %arg6[%c0_14, %c0_15], %16 {strides = array<i32>} : memref<16x32xbf16, #tpu.memory_space<vmem>>, vector<16x32xbf16>,
    } else {
    }
    return
  }
  func.func @transform_0(%arg0: i32, %arg1: i32, %arg2: i32) -> (i32, i32) {
    %c0_i32 = arith.constant 0 : i32
    return %arg0, %arg2 : i32, i32
  }
  func.func @transform_1(%arg0: i32, %arg1: i32, %arg2: i32) -> (i32, i32) {
    %c0_i32 = arith.constant 0 : i32
    return %arg2, %arg1 : i32, i32
  }
  func.func @transform_2(%arg0: i32, %arg1: i32, %arg2: i32) -> (i32, i32) {
    %c0_i32 = arith.constant 0 : i32
    %c0_i32_0 = arith.constant 0 : i32
    return %c0_i32, %arg1 : i32, i32
  }
  func.func @transform_3(%arg0: i32, %arg1: i32, %arg2: i32) -> (i32, i32) {
    %c0_i32 = arith.constant 0 : i32
    return %arg0, %arg1 : i32, i32
  }
}

</mosaic_0001>

<bundles_post_ra>
// kernel: tpu_custom_call.1
= control target key start
LH: loop header
LB: loop body
LE: loop exit
PB: predicated region body
PF: predicated region fallthrough
CT: control target
= control target key end

     0   :  { %8 = vsyncpa [#allocation4], 0  ;;  %s317_s0 = inlined_call_operand.hbm [shape: bf16[16,32], index: 0, kind: input, shape index: {}]   ;;  %s318_s1 = inlined_call_operand.hbm [shape: bf16[32,32], index: 1, kind: input, shape index: {}]   ;;  %s319_s2 = inlined_call_operand.vmem [shape: f32[1,32], index: 2, kind: input, shape index: {}]   ;;  %s320_s3 = inlined_call_operand.hbm [shape: bf16[16,32], index: 3, kind: output, shape index: {}]  }
   0x1   :  { %9 = vsyncpa [#allocation7], 0 }
   0x2   :  { %10 = vsyncpa [#allocation5], 0  ;;  %s264_s12 = smov [#allocation3]  }
   0x3   :  { %s16_s13 = sshll.u32 %s264_s12, 4  ;;  %s17_s13 = int_to_ptr.vmem [resolvable:$true] %s16_s13 }
   0x4   :  { %s206_s14 = scalar_lea.vmem %s17_s13, 128  ;;  %p211_p1 = scmp.lt.s32.totalorder %s17_s13, %s17_s13 }
   0x5   :  { %p207_p0 = scmp.ne.s32.totalorder %s17_s13, %s206_s14  ;;  %p212_p2 = scmp.lt.s32.totalorder %s206_s14, %s206_s14 }
   0x7   :  { %p213_p3 = por %p212_p2, %p211_p1 }
   0x9   :  { %p214_p4 = pnand %p213_p3, %p207_p0 }
   0xb   :  { %217 = shalt.err (!%p214_p4)
}
   0xc   :  { %s265_s15 = smov 64   ;;  %s266_s16 = smov 4  }
   0xd   :  { %22 = dma.hbm_to_vmem [thread:$0]  %s317_s0, 128, %s17_s13, [#allocation4], %s265_s15, %s265_s15, %s266_s16  }
   0xe   :  { %s267_s19 = smov [#allocation6]  }
   0xf   :  { %s28_s20 = sshll.u32 %s267_s19, 4  ;;  %s29_s20 = int_to_ptr.vmem [resolvable:$true] %s28_s20 }
  0x10   :  { %s226_s21 = scalar_lea.vmem %s29_s20, 256  ;;  %p231_p6 = scmp.lt.s32.totalorder %s29_s20, %s29_s20 }
  0x11   :  { %p227_p5 = scmp.ne.s32.totalorder %s29_s20, %s226_s21  ;;  %p232_p7 = scmp.lt.s32.totalorder %s226_s21, %s226_s21 }
  0x13   :  { %p233_p8 = por %p232_p7, %p231_p6 }
  0x15   :  { %p234_p9 = pnand %p233_p8, %p227_p5 }
  0x17   :  { %237 = shalt.err (!%p234_p9)
}
  0x18   :  { %34 = dma.hbm_to_vmem [thread:$0]  %s318_s1, 256, %s29_s20, [#allocation7], %s265_s15, %s265_s15, %s266_s16  }
  0x19   :  { %258 = dma.done.wait [#allocation4], 128  }
  0x1a   :  { %259 = vsyncadd [#allocation4], 4294967168 }
  0x1b   :  { %260 = dma.done.wait [#allocation7], 256  }
  0x1c   :  { %261 = vsyncadd [#allocation7], 4294967040  ;;  %vm48_vm0 = vcmask 261120   ;;  %v268_v0 = vmov 0.0   ;;  %vm269_vm1 = vmmov 0   ;;  %v195_v1 = vld [vmem:[#allocation6 + $0x8] sm:$0xff]  }
  0x1d   :  { %180 = vmatprep.subr.bf16.mxu0 %v268_v0  ;;  %184 = vmatprep.mubr.msk.bf16.mxu0 %vm269_vm1, %v268_v0  ;;  %49 = vst.msk [vmem:[#allocation2] sm:$0xff] %vm48_vm0, %v268_v0  ;;  %50 = vst.msk [vmem:[#allocation2 + $0x8] sm:$0xff] %vm48_vm0, %v268_v0  ;;  %v196_v2 = vld [vmem:[#allocation6] sm:$0xff]   ;;  %v197_v3 = vld [vmem:[#allocation3] sm:$0xff]   ;;  %vm147_vm2 = vcmask 257024   ;;  %s270_s24 = smov [#allocation8]  }
  0x1e   :  { %181 = vmatpush3.bf16.msra.mxu0 %v195_v1  ;;  %v172_v12 = vld [vmem:[%s319_s2] ss:$0 sm:$0xff]  ;;  %s155_s25 = sshll.u32 %s270_s24, 4  ;;  %s156_s25 = int_to_ptr.vmem [resolvable:$true] %s155_s25 }
  0x1f   :  { %182 = vmatprep.subr.bf16.mxu0 %v268_v0  ;;  %s238_s26 = scalar_lea.vmem %s156_s25, 128  ;;  %p243_p11 = scmp.lt.s32.totalorder %s156_s25, %s156_s25 }
  0x20   :  { %p239_p10 = scmp.ne.s32.totalorder %s156_s25, %s238_s26  ;;  %p244_p12 = scmp.lt.s32.totalorder %s238_s26, %s238_s26 }
  0x22   :  { %183 = vmatpush3.bf16.msra.mxu0 %v196_v2  ;;  %p245_p13 = por %p244_p12, %p243_p11 }
  0x24   :  { %v51_v4 = vld [vmem:[#allocation2] sm:$0xff]  ;;  %v52_v8 = vld [vmem:[#allocation2 + $0x8] sm:$0xff]  ;;  %p246_p0 = pnand %p245_p13, %p239_p10 }
  0x25   :  { %185 = vmatmul.mubr.msk.bf16.vlgmr.msra.gmra.mxu0 %vm48_vm0, %v197_v3 }
  0xe5   :  { %v114_v5 = vpop.f32.mrf.mxu0 }
  0xe6   :  { %v121_v6 = vadd.f32 %v114_v5, %v51_v4 }
  0xe7   :  { %v186_v7 = vpop.f32.mrf.mxu0 }
  0xe8   :  { %123 = vst.msk [vmem:[#allocation2] sm:$0xff] %vm48_vm0, %v121_v6 }
  0xe9   :  { %v117_v9 = vpop.f32.mrf.mxu0 }
  0xea   :  { %v122_v10 = vadd.f32 %v117_v9, %v52_v8 }
  0xeb   :  { %v187_v11 = vpop.f32.mrf.mxu0 }
  0xec   :  { %124 = vst.msk [vmem:[#allocation2 + $0x8] sm:$0xff] %vm48_vm0, %v122_v10 }
  0xef   :  { %v128_v13 = vld [vmem:[#allocation2] sm:$0xff] }
  0xf0   :  { %v137_v14 = vadd.f32 %v172_v12, %v128_v13 }
  0xf2   :  { %v175_v15 = vpack.c.bf16 %v137_v14, %v137_v14 }
  0xf3   :  { %v129_v16 = vld [vmem:[#allocation2 + $0x8] sm:$0xff] }
  0xf4   :  { %v138_v17 = vadd.f32 %v172_v12, %v129_v16  ;;  %148 = vst.msk [vmem:[#allocation8] sm:$0xf] %vm147_vm2, %v175_v15 }
  0xf6   :  { %v176_v18 = vpack.c.bf16 %v138_v17, %v138_v17 }
  0xf8   :  { %149 = vst.msk [vmem:[#allocation8 + $0x4] sm:$0xf] %vm147_vm2, %v176_v18 }
  0xf9   :  { %249 = shalt.err (!%p246_p0)
}
  0xfa   :  { %161 = dma.vmem_to_hbm [thread:$0]  %s156_s25, 128, %s320_s3, [#allocation5], %s265_s15, %s265_s15, %s266_s16  }
  0xfb   :  { %262 = dma.done.wait [#allocation5], 128  }
  0xfc   :  { %263 = vsyncadd [#allocation5], 4294967168 }
  0xfd   :  { %165 = vsyncpa [#allocation4], 1 }
  0xfe   :  { %166 = vsyncpa [#allocation7], 1 }
  0xff   :  { %167 = vsyncpa [#allocation5], 1 }

</bundles_post_ra>
